<compile_context>
chip_gen: v6e
topology: v6e:2x2x1
jax: 0.10.0
libtpu: 0.0.40
codegen_flags: <defaults>
</compile_context>

<pallas_src>
import functools
import math

import jax
import jax.numpy as jnp
from jax.experimental import pallas as pl
from jax.experimental.pallas import tpu as pltpu

# Fixed breakpoints (match the PyTorch module __init__).
_X1 = -2.0
_X2 = 2.0
_Y1 = 1.0 / (1.0 + math.exp(-_X1))   # sigmoid(-2)
_Y2 = 1.0 / (1.0 + math.exp(-_X2))   # sigmoid(+2)
_C1 = _Y1 - _X1                      # left-tail offset:  f(x) = x + C1
_C2 = _Y2 - _X2                      # right-tail offset: f(x) = x + C2

# Inputs larger than this never run with grid=(1,) (no pipelining / no 2-TC split).
_SPLIT_THRESHOLD_BYTES = 512 * 1024


@functools.lru_cache(maxsize=1)
def _device_config():
    """Return (tensorcores_per_chip, target_block_bytes) for the local TPU gen."""
    try:
        kind = jax.devices()[0].device_kind.lower()
    except Exception:  # pragma: no cover - defensive; fall back to conservative.
        kind = ""
    if any(v in kind for v in ("v2", "v3", "v4", "v5")):
        return 1, 1 << 20        # v5e & older: 16 MiB scoped-VMEM default -> ~1 MiB blocks
    if "v6" in kind:
        return 1, 2 << 20        # v6e: 1 TC, 32 MiB scoped default -> ~2 MiB blocks
    if "7" in kind:
        return 2, 4 << 20        # v7x: 2 TCs, 3.2 TB/s HBM -> bigger blocks amortize step cost
    return 1, 1 << 20            # unknown: conservative


def _sigmoid_fixed_kernel(x_ref, o_ref):
    # Compute in f32 regardless of storage dtype (v5e has no bf16 VPU/EUP).
    x = x_ref[...].astype(jnp.float32)
    below = x < _X1
    lin = x + jnp.where(below, _C1, _C2)          # both linear tails in one select
    tails = below | (x > _X2)                     # reuse the compare (no abs needed)
    out = jnp.where(tails, lin, jax.nn.sigmoid(x))
    o_ref[...] = out.astype(o_ref.dtype)


def sigmoid_fixed(x):
    """Elementwise SigmoidFixed; accepts any shape / float dtype (NCHW in tests)."""
    orig_shape = x.shape
    dtype = x.dtype
    n = x.size
    itemsize = jnp.dtype(dtype).itemsize
    num_tc, target_block_bytes = _device_config()

    # Widest lane-dense slab width that divides n -> zero wrapper padding on the
    # common case.  Only truly ragged sizes (n % 128 != 0) take the pad path.
    lanes = None
    for cand in (1024, 512, 256, 128):
        if n % cand == 0:
            lanes = cand
            break

    x_flat = jnp.ravel(x)                 # metadata-only for contiguous input
    if lanes is None:
        # TODO(synk): replace pad+slice (≈3x HBM traffic) with a no-copy masked
        # lane-axis / 1-D BlockSpec path once validated in interpret mode.
        lanes = 128
        rows = pl.cdiv(n, lanes)
        x_flat = jnp.pad(x_flat, (0, rows * lanes - n))
        ragged = True
    else:
        rows = n // lanes
        ragged = False

    x2d = x_flat.reshape(rows, lanes)

    # Byte-based block target: bf16 gets 2x the elements of f32 per block, so
    # every dtype sees the same ~1-4 MiB DMA blocks (near HBM roofline).
    block_elems = max(8 * 128, target_block_bytes // itemsize)
    tile_rows = max(8, (block_elems // lanes) // 8 * 8)

    if rows <= tile_rows:
        min_steps = max(4, 2 * num_tc)
        if rows * lanes * itemsize >= _SPLIT_THRESHOLD_BYTES and rows >= 8 * min_steps:
            # Medium input that fits one block: still split into >=4 steps so
            # DMA-in / compute / DMA-out overlap (and v7x's 2 TCs share work).
            tile_rows = max(8, (pl.cdiv(rows, min_steps) + 7) // 8 * 8)
        else:
            tile_rows = rows              # single block == full array dims (always legal)

    num_blocks = pl.cdiv(rows, tile_rows)
    # 2-TC chips only (v7x): even out small odd grids so both TensorCores get
    # equal work.  Never fires on v5e/v6e (1 TC), where halving would only
    # shrink DMAs and double per-step overhead.  For large grids the <=1 block
    # of imbalance is cheaper than halving every block.
    if num_tc >= 2 and 1 < num_blocks < 16 and num_blocks % 2 == 1:
        smaller = max(8, (tile_rows // 2) // 8 * 8)
        if smaller < tile_rows and pl.cdiv(rows, smaller) % 2 == 0:
            tile_rows = smaller
            num_blocks = pl.cdiv(rows, tile_rows)
    grid = (num_blocks,)                  # ragged last block handled by boundary masking

    # TODO(synk): on v7x, verify plain "parallel" actually shards the grid over
    # both TensorCores; otherwise switch to pltpu.CORE_PARALLEL.
    out2d = pl.pallas_call(
        _sigmoid_fixed_kernel,
        out_shape=jax.ShapeDtypeStruct((rows, lanes), dtype),
        grid=grid,
        in_specs=[pl.BlockSpec((tile_rows, lanes), lambda i: (i, 0))],
        out_specs=pl.BlockSpec((tile_rows, lanes), lambda i: (i, 0)),
        compiler_params=pltpu.CompilerParams(
            dimension_semantics=("parallel",)),
    )(x2d)

    out = out2d.reshape(-1)
    if ragged:
        out = out[:n]
    return out.reshape(orig_shape)


def sigmoid_fixed_ref(x):
    """Pure-JAX reference, faithful to the PyTorch formula."""
    xf = x.astype(jnp.float32)
    out = jnp.where(
        xf < _X1, _Y1 + xf - _X1,
        jnp.where(xf > _X2, _Y2 + xf - _X2, jax.nn.sigmoid(xf)))
    return out.astype(x.dtype)


if __name__ == "__main__":
    key = jax.random.PRNGKey(0)
    # NCHW input, scaled so all three pieces of the function are exercised.
    x = jax.random.normal(key, (2, 4, 16, 16), dtype=jnp.float32) * 4.0

    y = jax.block_until_ready(sigmoid_fixed(x))
    y_ref = sigmoid_fixed_ref(x)
    assert y.shape == x.shape and y.dtype == x.dtype
    assert jnp.allclose(y, y_ref, atol=1e-6, rtol=1e-5), "f32 mismatch vs reference"

    # Ragged element count (exercises the pad+slice fallback).
    x_odd = jax.random.normal(jax.random.PRNGKey(1), (3, 5, 7, 11),
                              dtype=jnp.float32) * 4.0
    y_odd = jax.block_until_ready(sigmoid_fixed(x_odd))
    assert jnp.allclose(y_odd, sigmoid_fixed_ref(x_odd), atol=1e-6, rtol=1e-5)

    # Multi-block input with a partial last block (exercises grid > 1 + masking
    # and, on large-block configs, the ">=4 step" split path).
    x_big = jax.random.normal(jax.random.PRNGKey(2), (2, 4, 200, 200),
                              dtype=jnp.float32) * 4.0
    y_big = jax.block_until_ready(sigmoid_fixed(x_big))
    assert jnp.allclose(y_big, sigmoid_fixed_ref(x_big), atol=1e-6, rtol=1e-5)

    # bf16 stays bf16 in HBM (halves memory traffic); compute is f32 in-kernel.
    # Byte-based block sizing gives bf16 the same block bytes as f32.
    x_bf16 = x.astype(jnp.bfloat16)
    y_bf16 = jax.block_until_ready(sigmoid_fixed(x_bf16))
    assert y_bf16.dtype == jnp.bfloat16
    assert jnp.allclose(y_bf16.astype(jnp.float32),
                        sigmoid_fixed_ref(x_bf16).astype(jnp.float32),
                        atol=2e-2, rtol=2e-2), "bf16 mismatch vs reference"

    # Larger bf16 tensor to exercise the byte-based multi-block path.
    x_big_bf16 = x_big.astype(jnp.bfloat16)
    y_big_bf16 = jax.block_until_ready(sigmoid_fixed(x_big_bf16))
    assert jnp.allclose(y_big_bf16.astype(jnp.float32),
                        sigmoid_fixed_ref(x_big_bf16).astype(jnp.float32),
                        atol=2e-2, rtol=2e-2)

    print("KERNEL_OK")
</pallas_src>

<mosaic_0001>
module attributes {stable_mosaic.version = 11 : i64} {
  func.func @_sigmoid_fixed_kernel(%arg0: i32, %arg1: memref<2x1024xf32, #tpu.memory_space<vmem>>, %arg2: memref<2x1024xf32, #tpu.memory_space<vmem>>) attributes {dimension_semantics = [#tpu.dimension_semantics<parallel>], iteration_bounds = array<i64: 1>, scalar_prefetch = 0 : i64, scratch_operands = 0 : i64, tpu.core_type = #tpu.core_type<tc>, window_params = [{transform_indices = @transform_0, window_bounds = array<i64: 2, 1024>}, {transform_indices = @transform_1, window_bounds = array<i64: 2, 1024>}]} {
    %c0 = arith.constant 0 : index
    %c0_0 = arith.constant 0 : index
    %0 = vector.load %arg1[%c0, %c0_0] : memref<2x1024xf32, #tpu.memory_space<vmem>>, vector<2x1024xf32>
    %cst = arith.constant -2.000000e+00 : f32
    %1 = vector.broadcast %cst : f32 to vector<2x1024xf32>
    %2 = arith.cmpf olt, %0, %1 : vector<2x1024xf32>
    %cst_1 = arith.constant 2.11920285 : f32
    %cst_2 = arith.constant -1.11920297 : f32
    %3 = vector.broadcast %cst_1 : f32 to vector<2x1024xf32>
    %4 = vector.broadcast %cst_2 : f32 to vector<2x1024xf32>
    %5 = arith.select %2, %3, %4 : vector<2x1024xi1>, vector<2x1024xf32>
    %6 = arith.addf %0, %5 : vector<2x1024xf32>
    %cst_3 = arith.constant 2.000000e+00 : f32
    %7 = vector.broadcast %cst_3 : f32 to vector<2x1024xf32>
    %8 = arith.cmpf ogt, %0, %7 : vector<2x1024xf32>
    %9 = arith.ori %2, %8 : vector<2x1024xi1>
    %10 = arith.negf %0 : vector<2x1024xf32>
    %11 = math.exp %10 : vector<2x1024xf32>
    %cst_4 = arith.constant 1.000000e+00 : f32
    %12 = vector.broadcast %cst_4 : f32 to vector<2x1024xf32>
    %13 = arith.addf %12, %11 : vector<2x1024xf32>
    %14 = arith.divf %12, %13 : vector<2x1024xf32>
    %15 = arith.select %9, %6, %14 : vector<2x1024xi1>, vector<2x1024xf32>
    %c0_5 = arith.constant 0 : index
    %c0_6 = arith.constant 0 : index
    %16 = vector.load %arg2[%c0_5, %c0_6] : memref<2x1024xf32, #tpu.memory_space<vmem>>, vector<2x1024xf32>
    tpu.vector_store %arg2[%c0_5, %c0_6], %15 {strides = array<i32>} : memref<2x1024xf32, #tpu.memory_space<vmem>>, vector<2x1024xf32>,
    return
  }
  func.func @transform_0(%arg0: i32) -> (i32, i32) {
    %c0_i32 = arith.constant 0 : i32
    %c0_i32_0 = arith.constant 0 : i32
    return %arg0, %c0_i32 : i32, i32
  }
  func.func @transform_1(%arg0: i32) -> (i32, i32) {
    %c0_i32 = arith.constant 0 : i32
    %c0_i32_0 = arith.constant 0 : i32
    return %arg0, %c0_i32 : i32, i32
  }
}

</mosaic_0001>

<bundles_post_ra>
// kernel: tpu_custom_call.1
= control target key start
LH: loop header
LB: loop body
LE: loop exit
PB: predicated region body
PF: predicated region fallthrough
CT: control target
= control target key end

     0   :  { %6 = vsyncpa [#allocation3], 0  ;;  %s140_s0 = inlined_call_operand.hbm [shape: f32[2,1024], index: 0, kind: input, shape index: {}]   ;;  %s141_s1 = inlined_call_operand.hbm [shape: f32[2,1024], index: 1, kind: output, shape index: {}]  }
   0x1   :  { %7 = vsyncpa [#allocation4], 0  ;;  %s121_s6 = smov [#allocation2]  }
   0x2   :  { %s14_s7 = sshll.u32 %s121_s6, 4  ;;  %s15_s7 = int_to_ptr.vmem [resolvable:$true] %s14_s7 }
   0x3   :  { %s85_s8 = scalar_lea.vmem %s15_s7, 256  ;;  %p90_p1 = scmp.lt.s32.totalorder %s15_s7, %s15_s7 }
   0x4   :  { %p86_p0 = scmp.ne.s32.totalorder %s15_s7, %s85_s8  ;;  %p91_p2 = scmp.lt.s32.totalorder %s85_s8, %s85_s8 }
   0x6   :  { %p92_p3 = por %p91_p2, %p90_p1 }
   0x8   :  { %p93_p4 = pnand %p92_p3, %p86_p0 }
   0xa   :  { %96 = shalt.err (!%p93_p4)
}
   0xb   :  { %17 = dma.hbm_to_vmem [thread:$0]  %s140_s0, 256, %s15_s7, [#allocation3]  }
   0xc   :  { %117 = dma.done.wait [#allocation3], 256  }
   0xd   :  { %118 = vsyncadd [#allocation3], 4294967040  ;;  %v21_v0 = vld [vmem:[#allocation2] sm:$0xff]  ;;  %v22_v1 = vld [vmem:[#allocation2 + $0x8] sm:$0xff]  ;;  %v122_v8 = vmov -1.119203  }
   0xe   :  { %v64_v2 = vmul.f32 -1.442695, %v21_v0  ;;  %v65_v3 = vmul.f32 -1.442695, %v22_v1  ;;  %vm23_vm0 = vcmp.lt.f32.partialorder %v21_v0, -2.0  ;;  %vm24_vm1 = vcmp.lt.f32.partialorder %v22_v1, -2.0 }
   0xf   :  { %v25_v9 = vsel %vm23_vm0, 2.1192029, %v122_v8  ;;  %vm29_vm2 = vcmp.gt.f32.partialorder %v21_v0, 2.0  ;;  %v26_v10 = vsel %vm24_vm1, 2.1192029, %v122_v8  ;;  %vm30_vm3 = vcmp.gt.f32.partialorder %v22_v1, 2.0 }
  0x10   :  { %69 = vpow2.f32 %v64_v2  ;;  %v27_v11 = vadd.f32 %v25_v9, %v21_v0  ;;  %vm31_vm4 = vmor %vm23_vm0, %vm29_vm2  ;;  %v28_v12 = vadd.f32 %v26_v10, %v22_v1  ;;  %s123_s0 = smov [#allocation5]  }
  0x11   :  { %71 = vpow2.f32 %v65_v3  ;;  %s55_s11 = sshll.u32 %s123_s0, 4  ;;  %vm32_vm5 = vmor %vm24_vm1, %vm30_vm3  ;;  %s56_s11 = int_to_ptr.vmem [resolvable:$true] %s55_s11 }
  0x12   :  { %s97_s12 = scalar_lea.vmem %s56_s11, 256  ;;  %p102_p6 = scmp.lt.s32.totalorder %s56_s11, %s56_s11 }
  0x13   :  { %p98_p5 = scmp.ne.s32.totalorder %s56_s11, %s97_s12  ;;  %p103_p7 = scmp.lt.s32.totalorder %s97_s12, %s97_s12 }
  0x15   :  { %p104_p8 = por %p103_p7, %p102_p6 }
  0x17   :  { %p105_p9 = pnand %p104_p8, %p98_p5 }
  0x1d   :  { %v70_v4 = vpop.eup %69 }
  0x1e   :  { %v39_v5 = vadd.f32 1.0, %v70_v4  ;;  %v72_v6 = vpop.eup %71 }
  0x1f   :  { %v40_v7 = vadd.f32 1.0, %v72_v6 }
  0x20   :  { %73 = vrcp.f32 %v39_v5 }
  0x21   :  { %75 = vrcp.f32 %v40_v7 }
  0x2d   :  { %v74_v13 = vpop.eup %73 }
  0x2e   :  { %v45_v14 = vsel %vm31_vm4, %v27_v11, %v74_v13  ;;  %v76_v15 = vpop.eup %75 }
  0x2f   :  { %47 = vst [vmem:[#allocation5] sm:$0xff] %v45_v14  ;;  %v46_v16 = vsel %vm32_vm5, %v28_v12, %v76_v15 }
  0x30   :  { %48 = vst [vmem:[#allocation5 + $0x8] sm:$0xff] %v46_v16 }
  0x31   :  { %108 = shalt.err (!%p105_p9)
}
  0x32   :  { %58 = dma.vmem_to_hbm [thread:$0]  %s56_s11, 256, %s141_s1, [#allocation4]  }
  0x33   :  { %119 = dma.done.wait [#allocation4], 256  }
  0x34   :  { %120 = vsyncadd [#allocation4], 4294967040 }
  0x35   :  { %62 = vsyncpa [#allocation3], 1 }
  0x36   :  { %63 = vsyncpa [#allocation4], 1 }

</bundles_post_ra>
